<compile_context>
chip_gen: v6e
topology: v6e:2x2x1
jax: 0.10.0
libtpu: 0.0.40
codegen_flags: <defaults>
</compile_context>

<pallas_src>
import jax
import jax.numpy as jnp
from jax.experimental import pallas as pl
from jax.experimental.pallas import tpu as pltpu


def _ceil_to(x: int, m: int) -> int:
    return ((x + m - 1) // m) * m


def _lm_head_kernel(x_ref, w_ref, b_ref, o_ref):
    k = pl.program_id(2)

    @pl.when(k == 0)
    def _init():
        # Resident f32 output block: initialize with the bias (added exactly
        # once) and accumulate straight into it — no separate VMEM scratch.
        o_ref[...] = jnp.broadcast_to(b_ref[...], o_ref.shape)

    # bf16 x bf16 -> f32 accumulate on the MXU.
    o_ref[...] += jnp.dot(
        x_ref[...], w_ref[...], preferred_element_type=jnp.float32
    )


def lm_head_pallas(x_bf16, w_p, b2d_p, *, tm, tn, tk, V):
    """x_bf16: (M, H) bf16 (unpadded); w_p: (Hp, Vp) bf16 pre-padded;
    b2d_p: (1, Vp) f32 pre-padded.  Returns (M, V) f32 logits."""
    M, H = x_bf16.shape
    Hp, Vp = w_p.shape
    assert Vp % tn == 0 and Hp % tk == 0 and Hp >= H

    # M tile: decode-sized M keeps tm == M (one W pass); prefill-sized M uses
    # tm=512 blocks so W is re-streamed only Mp/tm times.
    if M <= tm:
        tm_eff = max(_ceil_to(M, 8), 8)
        Mp = tm_eff
    else:
        tm_eff = tm
        Mp = _ceil_to(M, tm_eff)

    x = x_bf16
    if (Mp, Hp) != (M, H):
        x = jnp.pad(x, ((0, Mp - M), (0, Hp - H)))  # zero pad: inert for matmul

    grid = (Mp // tm_eff, Vp // tn, Hp // tk)

    cost = pl.CostEstimate(
        flops=2 * Mp * Hp * Vp,
        transcendentals=0,
        bytes_accessed=(
            (Mp * Hp * 2) * (Vp // tn)        # x re-read per j block
            + (Hp * Vp * 2) * (Mp // tm_eff)  # w re-read per i block
            + (Vp * 4) * (Mp // tm_eff)       # bias
            + Mp * Vp * 4                     # logits writeback
        ),
    )

    out = pl.pallas_call(
        _lm_head_kernel,
        out_shape=jax.ShapeDtypeStruct((Mp, Vp), jnp.float32),
        grid_spec=pltpu.PrefetchScalarGridSpec(
            num_scalar_prefetch=0,
            grid=grid,
            in_specs=[
                pl.BlockSpec((tm_eff, tk), lambda i, j, k: (i, k)),
                pl.BlockSpec((tk, tn), lambda i, j, k: (k, j)),
                pl.BlockSpec((1, tn), lambda i, j, k: (0, j)),
            ],
            out_specs=pl.BlockSpec((tm_eff, tn), lambda i, j, k: (i, j)),
        ),
        compiler_params=pltpu.CompilerParams(
            dimension_semantics=("parallel", "parallel", "arbitrary"),
            vmem_limit_bytes=48 * 1024 * 1024,
        ),
        cost_estimate=cost,
    )(x, w_p, b2d_p)

    if (Mp, Vp) != (M, V):
        out = out[:M, :V]
    return out


class WrapModel:
    """JAX/Pallas analogue of the PyTorch WrapModel: wraps the inner LM and
    returns outputs[0] == logits.

    Weight prep (bf16 cast + padding to tile multiples) happens ONCE here, so
    the per-forward path streams W exactly once per (i) block with no extra
    cast/pad passes over the weight matrix in HBM.
    """

    def __init__(self, emb_table, w_head, b_head, *, tm=512, tn=1024, tk=1024):
        H, V = w_head.shape
        assert emb_table.shape[1] == H and b_head.shape == (V,)

        # Tile sizing: lane dims multiples of 128, clamped to array extents.
        tn = min(tn, _ceil_to(V, 128))
        Vp = _ceil_to(V, tn)
        if H <= tk:
            tk, Hp = H, H
        else:
            Hp = _ceil_to(H, tk)

        w_p = w_head.astype(jnp.bfloat16)
        if (Hp, Vp) != (H, V):
            w_p = jnp.pad(w_p, ((0, Hp - H), (0, Vp - V)))
        b2d = b_head.astype(jnp.float32).reshape(1, V)
        if Vp != V:
            b2d = jnp.pad(b2d, ((0, 0), (0, Vp - V)))

        self.emb = emb_table.astype(jnp.bfloat16)  # bf16 at rest
        self.w_p = w_p
        self.b2d = b2d
        self.V = V
        self.Hp = Hp
        self.tm, self.tn, self.tk = tm, tn, tk

    def __call__(self, input_ids):
        B, S = input_ids.shape
        # TODO(synk): fuse the data-dependent embedding row gather into the
        # kernel (scalar-prefetched ids + per-row DMA gather); kept in XLA.
        x = jnp.take(self.emb, input_ids.reshape(-1), axis=0)  # (B*S, H) bf16
        logits_flat = lm_head_pallas(
            x, self.w_p, self.b2d,
            tm=self.tm, tn=self.tn, tk=self.tk, V=self.V,
        )
        logits = logits_flat.reshape(B, S, self.V)
        outputs = (logits,)       # inner model returns a tuple
        return outputs[0]         # WrapModel returns outputs[0]


if __name__ == "__main__":
    # Small deterministic config.
    B, S, H, V = 2, 8, 32, 128

    key = jax.random.PRNGKey(0)
    k_ids, k_emb, k_w, k_b = jax.random.split(key, 4)

    input_ids = jax.random.randint(k_ids, (B, S), 0, V, dtype=jnp.int32)
    emb_table = jax.random.normal(k_emb, (V, H), dtype=jnp.float32) * 0.02
    w_head = jax.random.normal(k_w, (H, V), dtype=jnp.float32) * 0.02
    b_head = jax.random.normal(k_b, (V,), dtype=jnp.float32) * 0.01

    model = WrapModel(emb_table, w_head, b_head)
    out = model(input_ids)
    out = jax.block_until_ready(out)

    # Reference with matching MXU semantics (bf16 operands, f32 accumulate).
    x_ref = jnp.take(emb_table, input_ids.reshape(-1), axis=0)
    xb = x_ref.astype(jnp.bfloat16).astype(jnp.float32)
    wb = w_head.astype(jnp.bfloat16).astype(jnp.float32)
    ref = (xb @ wb + b_head).reshape(B, S, V)

    assert out.shape == (B, S, V)
    assert out.dtype == jnp.float32
    assert jnp.allclose(out, ref, atol=1e-4, rtol=1e-3)

    # Sanity vs. full-f32 reference (bf16 rounding only).
    ref_f32 = (x_ref @ w_head + b_head).reshape(B, S, V)
    assert jnp.allclose(out, ref_f32, atol=5e-3, rtol=5e-2)

    print("KERNEL_OK")
</pallas_src>

<mosaic_0001>
module attributes {stable_mosaic.version = 11 : i64} {
  func.func @_lm_head_kernel(%arg0: i32, %arg1: i32, %arg2: i32, %arg3: memref<16x32xbf16, #tpu.memory_space<vmem>>, %arg4: memref<32x128xbf16, #tpu.memory_space<vmem>>, %arg5: memref<1x128xf32, #tpu.memory_space<vmem>>, %arg6: memref<16x128xf32, #tpu.memory_space<vmem>>) attributes {dimension_semantics = [#tpu.dimension_semantics<parallel>, #tpu.dimension_semantics<parallel>, #tpu.dimension_semantics<arbitrary>], iteration_bounds = array<i64: 1, 1, 1>, scalar_prefetch = 0 : i64, scratch_operands = 0 : i64, tpu.core_type = #tpu.core_type<tc>, window_params = [{transform_indices = @transform_0, window_bounds = array<i64: 16, 32>}, {transform_indices = @transform_1, window_bounds = array<i64: 32, 128>}, {transform_indices = @transform_2, window_bounds = array<i64: 1, 128>}, {transform_indices = @transform_3, window_bounds = array<i64: 16, 128>}]} {
    %c0_i32 = arith.constant 0 : i32
    %0 = arith.cmpi eq, %arg2, %c0_i32 : i32
    %1 = arith.extui %0 : i1 to i32
    %c0_i32_0 = arith.constant 0 : i32
    %2 = arith.cmpi ne, %1, %c0_i32_0 : i32
    scf.if %2 {
      %c0_8 = arith.constant 0 : index
      %c0_9 = arith.constant 0 : index
      %9 = vector.load %arg5[%c0_8, %c0_9] : memref<1x128xf32, #tpu.memory_space<vmem>>, vector<1x128xf32>
      %10 = vector.shape_cast %9 : vector<1x128xf32> to vector<1x128xf32>
      %11 = vector.broadcast %10 : vector<1x128xf32> to vector<16x128xf32>
      %c0_10 = arith.constant 0 : index
      %c0_11 = arith.constant 0 : index
      %12 = vector.load %arg6[%c0_10, %c0_11] : memref<16x128xf32, #tpu.memory_space<vmem>>, vector<16x128xf32>
      tpu.vector_store %arg6[%c0_10, %c0_11], %11 {strides = array<i32>} : memref<16x128xf32, #tpu.memory_space<vmem>>, vector<16x128xf32>,
    } else {
    }
    %c0 = arith.constant 0 : index
    %c0_1 = arith.constant 0 : index
    %3 = vector.load %arg6[%c0, %c0_1] : memref<16x128xf32, #tpu.memory_space<vmem>>, vector<16x128xf32>
    %c0_2 = arith.constant 0 : index
    %c0_3 = arith.constant 0 : index
    %4 = vector.load %arg3[%c0_2, %c0_3] : memref<16x32xbf16, #tpu.memory_space<vmem>>, vector<16x32xbf16>
    %c0_4 = arith.constant 0 : index
    %c0_5 = arith.constant 0 : index
    %5 = vector.load %arg4[%c0_4, %c0_5] : memref<32x128xbf16, #tpu.memory_space<vmem>>, vector<32x128xbf16>
    %cst = arith.constant dense<0.000000e+00> : vector<16x128xf32>
    %6 = tpu.matmul %4, %5, %cst {dimension_numbers = #tpu.dot_dimension_numbers<[1], [0], [0], [1], [0, 0, 1, 1], [], []>} : vector<16x32xbf16>, vector<32x128xbf16>, vector<16x128xf32> -> vector<16x128xf32>
    %7 = arith.addf %3, %6 : vector<16x128xf32>
    %c0_6 = arith.constant 0 : index
    %c0_7 = arith.constant 0 : index
    %8 = vector.load %arg6[%c0_6, %c0_7] : memref<16x128xf32, #tpu.memory_space<vmem>>, vector<16x128xf32>
    tpu.vector_store %arg6[%c0_6, %c0_7], %7 {strides = array<i32>} : memref<16x128xf32, #tpu.memory_space<vmem>>, vector<16x128xf32>,
    return
  }
  func.func @transform_0(%arg0: i32, %arg1: i32, %arg2: i32) -> (i32, i32) {
    %c0_i32 = arith.constant 0 : i32
    return %arg0, %arg2 : i32, i32
  }
  func.func @transform_1(%arg0: i32, %arg1: i32, %arg2: i32) -> (i32, i32) {
    %c0_i32 = arith.constant 0 : i32
    return %arg2, %arg1 : i32, i32
  }
  func.func @transform_2(%arg0: i32, %arg1: i32, %arg2: i32) -> (i32, i32) {
    %c0_i32 = arith.constant 0 : i32
    %c0_i32_0 = arith.constant 0 : i32
    return %c0_i32, %arg1 : i32, i32
  }
  func.func @transform_3(%arg0: i32, %arg1: i32, %arg2: i32) -> (i32, i32) {
    %c0_i32 = arith.constant 0 : i32
    return %arg0, %arg1 : i32, i32
  }
}

</mosaic_0001>

<bundles_post_ra>
// kernel: tpu_custom_call.1
= control target key start
LH: loop header
LB: loop body
LE: loop exit
PB: predicated region body
PF: predicated region fallthrough
CT: control target
= control target key end

     0   :  { %8 = vsyncpa [#allocation3], 0  ;;  %s284_s0 = inlined_call_operand.hbm [shape: bf16[16,32], index: 0, kind: input, shape index: {}]   ;;  %s285_s1 = inlined_call_operand.hbm [shape: bf16[32,128], index: 1, kind: input, shape index: {}]   ;;  %s286_s2 = inlined_call_operand.vmem [shape: f32[1,128], index: 2, kind: input, shape index: {}]   ;;  %s287_s3 = inlined_call_operand.hbm [shape: f32[16,128], index: 3, kind: output, shape index: {}]  }
   0x1   :  { %9 = vsyncpa [#allocation6], 0 }
   0x2   :  { %10 = vsyncpa [#allocation4], 0  ;;  %s243_s12 = smov [#allocation2]  }
   0x3   :  { %s16_s13 = sshll.u32 %s243_s12, 4  ;;  %s17_s13 = int_to_ptr.vmem [resolvable:$true] %s16_s13 }
   0x4   :  { %s185_s14 = scalar_lea.vmem %s17_s13, 128  ;;  %p190_p1 = scmp.lt.s32.totalorder %s17_s13, %s17_s13 }
   0x5   :  { %p186_p0 = scmp.ne.s32.totalorder %s17_s13, %s185_s14  ;;  %p191_p2 = scmp.lt.s32.totalorder %s185_s14, %s185_s14 }
   0x7   :  { %p192_p3 = por %p191_p2, %p190_p1 }
   0x9   :  { %p193_p4 = pnand %p192_p3, %p186_p0 }
   0xb   :  { %196 = shalt.err (!%p193_p4)
}
   0xc   :  { %s244_s15 = smov 64   ;;  %s245_s16 = smov 4  }
   0xd   :  { %22 = dma.hbm_to_vmem [thread:$0]  %s284_s0, 128, %s17_s13, [#allocation3], %s244_s15, %s244_s15, %s245_s16  }
   0xe   :  { %s246_s19 = smov [#allocation5]  }
   0xf   :  { %s28_s20 = sshll.u32 %s246_s19, 4  ;;  %s29_s20 = int_to_ptr.vmem [resolvable:$true] %s28_s20 }
  0x10   :  { %s205_s21 = scalar_lea.vmem %s29_s20, 256  ;;  %p210_p6 = scmp.lt.s32.totalorder %s29_s20, %s29_s20 }
  0x11   :  { %p206_p5 = scmp.ne.s32.totalorder %s29_s20, %s205_s21  ;;  %p211_p7 = scmp.lt.s32.totalorder %s205_s21, %s205_s21 }
  0x13   :  { %p212_p8 = por %p211_p7, %p210_p6 }
  0x15   :  { %p213_p9 = pnand %p212_p8, %p206_p5 }
  0x17   :  { %216 = shalt.err (!%p213_p9)
}
  0x18   :  { %34 = dma.hbm_to_vmem [thread:$0]  %s285_s1, 256, %s29_s20, [#allocation6], %s244_s15, %s244_s15, %s245_s16  }
  0x19   :  { %237 = dma.done.wait [#allocation3], 128  }
  0x1a   :  { %238 = vsyncadd [#allocation3], 4294967168 }
  0x1b   :  { %239 = dma.done.wait [#allocation6], 256  }
  0x1c   :  { %240 = vsyncadd [#allocation6], 4294967040  ;;  %v247_v0 = vmov 0.0   ;;  %vm248_vm0 = vmmov 0   ;;  %v174_v1 = vld [vmem:[#allocation5 + $0x8] sm:$0xff]   ;;  %v175_v2 = vld [vmem:[#allocation5] sm:$0xff]  }
  0x1d   :  { %157 = vmatprep.subr.bf16.mxu0 %v247_v0  ;;  %161 = vmatprep.mubr.msk.bf16.mxu0 %vm248_vm0, %v247_v0  ;;  %v176_v3 = vld [vmem:[#allocation2] sm:$0xff]   ;;  %vm82_vm1 = vcmask 261120   ;;  %s249_s1 = smov [#allocation7]  }
  0x1e   :  { %158 = vmatpush3.bf16.msra.mxu0 %v174_v1  ;;  %v149_v4 = vld [vmem:[%s286_s2] ss:$0 sm:$0xff]  ;;  %s136_s25 = sshll.u32 %s249_s1, 4  ;;  %s137_s25 = int_to_ptr.vmem [resolvable:$true] %s136_s25 }
  0x1f   :  { %159 = vmatprep.subr.bf16.mxu0 %v247_v0  ;;  %s217_s26 = scalar_lea.vmem %s137_s25, 256  ;;  %p222_p11 = scmp.lt.s32.totalorder %s137_s25, %s137_s25 }
  0x20   :  { %p218_p10 = scmp.ne.s32.totalorder %s137_s25, %s217_s26  ;;  %p223_p12 = scmp.lt.s32.totalorder %s217_s26, %s217_s26 }
  0x22   :  { %160 = vmatpush3.bf16.msra.mxu0 %v175_v2  ;;  %p224_p13 = por %p223_p12, %p222_p11 }
  0x24   :  { %p225_p0 = pnand %p224_p13, %p218_p10 }
  0x25   :  { %162 = vmatmul.mubr.msk.bf16.vlgmr.msra.gmra.mxu0 %vm82_vm1, %v176_v3 }
  0xe5   :  { %v120_v5 = vpop.f32.mrf.mxu0 }
  0xe6   :  { %v127_v6 = vadd.f32 %v149_v4, %v120_v5 }
  0xe7   :  { %v163_v7 = vpop.f32.mrf.mxu0 }
  0xe8   :  { %129 = vst [vmem:[#allocation7] sm:$0xff] %v127_v6 }
  0xe9   :  { %v123_v8 = vpop.f32.mrf.mxu0 }
  0xea   :  { %v128_v9 = vadd.f32 %v149_v4, %v123_v8 }
  0xeb   :  { %v164_v10 = vpop.f32.mrf.mxu0 }
  0xec   :  { %130 = vst [vmem:[#allocation7 + $0x8] sm:$0xff] %v128_v9 }
  0xed   :  { %228 = shalt.err (!%p225_p0)
}
  0xee   :  { %s250_s27 = smov 128   ;;  %s251_s2 = smov 8  }
  0xef   :  { %142 = dma.vmem_to_hbm [thread:$0]  %s137_s25, 256, %s287_s3, [#allocation4], %s250_s27, %s250_s27, %s251_s2  }
  0xf0   :  { %241 = dma.done.wait [#allocation4], 256  }
  0xf1   :  { %242 = vsyncadd [#allocation4], 4294967040 }
  0xf2   :  { %146 = vsyncpa [#allocation3], 1 }
  0xf3   :  { %147 = vsyncpa [#allocation6], 1 }
  0xf4   :  { %148 = vsyncpa [#allocation4], 1 }

</bundles_post_ra>
